<compile_context>
chip_gen: v7x
topology: tpu7x:2x2x1
jax: 0.10.0
libtpu: 0.0.40
codegen_flags: <defaults>
</compile_context>

<pallas_src>
import functools
import math

import jax
import jax.numpy as jnp
from jax.experimental import pallas as pl
from jax.experimental.pallas import tpu as pltpu


def _lora_kernel(x_ref, a_ref, b_ref, o_ref, *, scaling):
    # x_ref: (tm, in_dim)   a_ref: (in_dim, r)   b_ref: (r, in_dim)
    t = jnp.dot(x_ref[...], a_ref[...], preferred_element_type=jnp.float32)
    y = jnp.dot(t.astype(x_ref.dtype), b_ref[...],
                preferred_element_type=jnp.float32)
    o_ref[...] = (y * scaling).astype(o_ref.dtype)


def _choose_tile_rows(rows, in_dim, dtype_bytes,
                      block_budget_bytes=16 * 1024 * 1024):
    """Largest 8-aligned row tile <= 1024 whose double-buffered x+y blocks fit
    the per-block VMEM budget (keeps v7x's 64 MiB VMEM comfortable)."""
    if rows <= 1024:
        return rows
    tm = 1024
    # 2 buffers for x block + 2 buffers for out block.
    while tm > 256 and 4 * tm * in_dim * dtype_bytes > block_budget_bytes:
        tm //= 2
    return max(tm, 8)


def _lora_2d(x2d, a, b, scaling, *, tile_rows=None):
    rows, in_dim = x2d.shape
    r = a.shape[1]
    dtype_bytes = jnp.dtype(x2d.dtype).itemsize

    if tile_rows is None:
        tile_rows = _choose_tile_rows(rows, in_dim, dtype_bytes)
    tile_rows = min(tile_rows, rows)
    grid = (pl.cdiv(rows, tile_rows),)

    block_bytes = tile_rows * in_dim * dtype_bytes
    param_bytes = 2 * in_dim * r * dtype_bytes
    vmem_limit = 4 * block_bytes + 2 * param_bytes + (2 << 20)
    vmem_limit = int(min(max(vmem_limit, 16 << 20), 128 << 20))

    kernel = functools.partial(_lora_kernel, scaling=float(scaling))

    return pl.pallas_call(
        kernel,
        out_shape=jax.ShapeDtypeStruct((rows, in_dim), x2d.dtype),
        grid_spec=pltpu.PrefetchScalarGridSpec(
            num_scalar_prefetch=0,
            grid=grid,
            in_specs=[
                pl.BlockSpec((tile_rows, in_dim), lambda i: (i, 0)),
                pl.BlockSpec((in_dim, r), lambda i: (0, 0)),   # A resident
                pl.BlockSpec((r, in_dim), lambda i: (0, 0)),   # B resident
            ],
            out_specs=pl.BlockSpec((tile_rows, in_dim), lambda i: (i, 0)),
        ),
        compiler_params=pltpu.CompilerParams(
            dimension_semantics=("parallel",),
            vmem_limit_bytes=vmem_limit,
        ),
    )(x2d, a, b)


def lora_forward(x, lora_a, lora_b, alpha=1):
    """y = (x @ lora_a @ lora_b) * (alpha / bottle_dim), matching the PyTorch
    LoRA module's forward. Works for any leading shape; last dim = in_dim."""
    in_dim, bottle_dim = lora_a.shape
    assert lora_b.shape == (bottle_dim, in_dim)
    assert x.shape[-1] == in_dim
    scaling = alpha / bottle_dim

    lead = x.shape[:-1]
    rows = 1
    for d in lead:
        rows *= d

    a = lora_a.astype(x.dtype)
    b = lora_b.astype(x.dtype)
    y2d = _lora_2d(x.reshape(rows, in_dim), a, b, scaling)
    return y2d.reshape(*lead, in_dim)


if __name__ == "__main__":
    key = jax.random.PRNGKey(0)
    k_x3, k_x2, k_a, k_b = jax.random.split(key, 4)

    in_dim, bottle_dim, alpha = 32, 4, 1
    batch, seq = 2, 8
    scaling = alpha / bottle_dim

    # Deterministic params. A ~ kaiming-uniform-like; B is randomized (PyTorch
    # inits B to zeros, which would make the correctness check trivial).
    bound = 1.0 / math.sqrt(in_dim)
    lora_a = jax.random.uniform(k_a, (in_dim, bottle_dim), jnp.float32,
                                -bound, bound)
    lora_b = 0.02 * jax.random.normal(k_b, (bottle_dim, in_dim),
                                      dtype=jnp.float32)

    # 3-D input (batch, seq, hidden).
    x3 = jax.random.normal(k_x3, (batch, seq, in_dim), dtype=jnp.float32)
    y3 = lora_forward(x3, lora_a, lora_b, alpha=alpha)
    jax.block_until_ready(y3)
    ref3 = (x3 @ lora_a @ lora_b) * scaling
    assert y3.shape == x3.shape
    assert jnp.allclose(y3, ref3, atol=1e-4, rtol=1e-4), "3D LoRA mismatch"

    # 2-D input (batch, hidden).
    x2 = jax.random.normal(k_x2, (batch, in_dim), dtype=jnp.float32)
    y2 = lora_forward(x2, lora_a, lora_b, alpha=alpha)
    jax.block_until_ready(y2)
    ref2 = (x2 @ lora_a @ lora_b) * scaling
    assert y2.shape == x2.shape
    assert jnp.allclose(y2, ref2, atol=1e-4, rtol=1e-4), "2D LoRA mismatch"

    print("KERNEL_OK")
</pallas_src>

<mosaic_0001>
module attributes {stable_mosaic.version = 11 : i64} {
  func.func @_lora_kernel(%arg0: i32, %arg1: memref<16x32xf32, #tpu.memory_space<vmem>>, %arg2: memref<32x4xf32, #tpu.memory_space<vmem>>, %arg3: memref<4x32xf32, #tpu.memory_space<vmem>>, %arg4: memref<16x32xf32, #tpu.memory_space<vmem>>) attributes {dimension_semantics = [#tpu.dimension_semantics<parallel>], iteration_bounds = array<i64: 1>, scalar_prefetch = 0 : i64, scratch_operands = 0 : i64, tpu.core_type = #tpu.core_type<tc>, window_params = [{transform_indices = @transform_0, window_bounds = array<i64: 16, 32>}, {pipeline_mode = #tpu.pipeline_mode<synchronous>, transform_indices = @transform_1, window_bounds = array<i64: 32, 4>}, {pipeline_mode = #tpu.pipeline_mode<synchronous>, transform_indices = @transform_2, window_bounds = array<i64: 4, 32>}, {transform_indices = @transform_3, window_bounds = array<i64: 16, 32>}]} {
    %c0 = arith.constant 0 : index
    %c0_0 = arith.constant 0 : index
    %0 = vector.load %arg1[%c0, %c0_0] : memref<16x32xf32, #tpu.memory_space<vmem>>, vector<16x32xf32>
    %c0_1 = arith.constant 0 : index
    %c0_2 = arith.constant 0 : index
    %1 = vector.load %arg2[%c0_1, %c0_2] : memref<32x4xf32, #tpu.memory_space<vmem>>, vector<32x4xf32>
    %cst = arith.constant dense<0.000000e+00> : vector<16x4xf32>
    %2 = tpu.matmul %0, %1, %cst {dimension_numbers = #tpu.dot_dimension_numbers<[1], [0], [0], [1], [0, 0, 1, 1], [], []>} : vector<16x32xf32>, vector<32x4xf32>, vector<16x4xf32> -> vector<16x4xf32>
    %c0_3 = arith.constant 0 : index
    %c0_4 = arith.constant 0 : index
    %3 = vector.load %arg3[%c0_3, %c0_4] : memref<4x32xf32, #tpu.memory_space<vmem>>, vector<4x32xf32>
    %cst_5 = arith.constant dense<0.000000e+00> : vector<16x32xf32>
    %4 = tpu.matmul %2, %3, %cst_5 {dimension_numbers = #tpu.dot_dimension_numbers<[1], [0], [0], [1], [0, 0, 1, 1], [], []>} : vector<16x4xf32>, vector<4x32xf32>, vector<16x32xf32> -> vector<16x32xf32>
    %cst_6 = arith.constant 2.500000e-01 : f32
    %5 = vector.broadcast %cst_6 : f32 to vector<16x32xf32>
    %6 = arith.mulf %4, %5 : vector<16x32xf32>
    %c0_7 = arith.constant 0 : index
    %c0_8 = arith.constant 0 : index
    %7 = vector.load %arg4[%c0_7, %c0_8] : memref<16x32xf32, #tpu.memory_space<vmem>>, vector<16x32xf32>
    tpu.vector_store %arg4[%c0_7, %c0_8], %6 {strides = array<i32>} : memref<16x32xf32, #tpu.memory_space<vmem>>, vector<16x32xf32>,
    return
  }
  func.func @transform_0(%arg0: i32) -> (i32, i32) {
    %c0_i32 = arith.constant 0 : i32
    %c0_i32_0 = arith.constant 0 : i32
    return %arg0, %c0_i32 : i32, i32
  }
  func.func @transform_1(%arg0: i32) -> (i32, i32) {
    %c0_i32 = arith.constant 0 : i32
    %c0_i32_0 = arith.constant 0 : i32
    %c0_i32_1 = arith.constant 0 : i32
    return %c0_i32, %c0_i32_0 : i32, i32
  }
  func.func @transform_2(%arg0: i32) -> (i32, i32) {
    %c0_i32 = arith.constant 0 : i32
    %c0_i32_0 = arith.constant 0 : i32
    %c0_i32_1 = arith.constant 0 : i32
    return %c0_i32, %c0_i32_0 : i32, i32
  }
  func.func @transform_3(%arg0: i32) -> (i32, i32) {
    %c0_i32 = arith.constant 0 : i32
    %c0_i32_0 = arith.constant 0 : i32
    return %arg0, %c0_i32 : i32, i32
  }
}

</mosaic_0001>

<bundles_post_ra>
// kernel: tpu_custom_call.1
= control target key start
LH: loop header
LB: loop body
LE: loop exit
PB: predicated region body
PF: predicated region fallthrough
CT: control target
= control target key end

     0   :  { %vm21_vm0 = vcmask 261120   ;;  %s335_s0 = inlined_call_operand.vmem [shape: f32[16,32], index: 0, kind: input, shape index: {}]   ;;  %s336_s1 = inlined_call_operand.vmem [shape: f32[32,4], index: 1, kind: input, shape index: {}]   ;;  %s337_s2 = inlined_call_operand.vmem [shape: f32[4,32], index: 2, kind: input, shape index: {}]   ;;  %s338_s3 = inlined_call_operand.hbm [shape: f32[16,32], index: 3, kind: output, shape index: {}]  }
   0x1   :  { %v17_v0 = vld [vmem:[%s336_s1] sm:$0xff]  ;;  %v18_v1 = vld [vmem:[%s336_s1 + $0x8] sm:$0xff]  ;;  %v19_v2 = vld [vmem:[%s336_s1 + $0x10] sm:$0xff] }
   0x2   :  { %v240_v3 = vpack.c.bf16 %v18_v1, %v17_v0  ;;  %v20_v4 = vld [vmem:[%s336_s1 + $0x18] sm:$0xff]  ;;  %v15_v5 = vld [vmem:[%s335_s0] sm:$0xff] }
   0x3   :  { %v244_v6 = vpack.c.bf16 %v20_v4, %v19_v2  ;;  %232 = vmatprep.mubr.msk.f32.mxu0 %vm21_vm0, %v15_v5 }
   0x4   :  { %8 = vsyncpa [#allocation3], 0  ;;  %241 = vmatprep.subr.bf16.mxu0 %v240_v3  ;;  %v16_v7 = vld [vmem:[%s335_s0 + $0x8] sm:$0xff]  ;;  %v103_v8 = vld [vmem:[%s337_s2] sm:$0xf]  ;;  %vm111_vm1 = vcmask 1043456  }
   0x5   :  { %243 = vmatpush3.bf16.msra.mxu0 %v240_v3  ;;  %235 = vmatprep.subr.msk.mxu1 %vm111_vm1, %v103_v8  ;;  %vm104_vm2 = vcmask 31744   ;;  %s275_s25 = smov [#allocation2]  }
   0x6   :  { %245 = vmatprep.subr.bf16.mxu0 %v244_v6  ;;  %236 = vmatpush3.msk.msra.mxu1 %vm111_vm1, %v103_v8  ;;  %s199_s26 = sshll.u32 %s275_s25, 4  ;;  %s200_s26 = int_to_ptr.vmem [resolvable:$true] %s199_s26 }
   0x7   :  { %s251_s0 = scalar_lea.vmem %s200_s26, 256  ;;  %p256_p1 = scmp.lt.s32.totalorder %s200_s26, %s200_s26 }
   0x8   :  { %p252_p0 = scmp.ne.s32.totalorder %s200_s26, %s251_s0  ;;  %p257_p2 = scmp.lt.s32.totalorder %s251_s0, %s251_s0 }
   0x9   :  { %247 = vmatpush3.bf16.msra.mxu0 %v244_v6 }
   0xa   :  { %p258_p3 = por %p257_p2, %p256_p1 }
   0xc   :  { %233 = vmatmul.mubr.msk.f32.vlgmr.msra.gmra.mrb[0].mxu0 %vm21_vm0, %v16_v7  ;;  %p259_p4 = pnand %p258_p3, %p252_p0 }
  0xdf   :  { %v234_v9 = vpop.f32.mrb[0].mxu0 }
  0xe0   :  { %v94_v10 = vpop.f32.mrb[1].mxu0 }
  0xe1   :  { %237 = vmatprep.mubr.msk.f32.mxu1 %vm104_vm2, %v94_v10 }
  0xe2   :  { %238 = vmatmul.mubr.msk.f32.vlgmr.msra.gmra.mrb[0].mxu1 %vm104_vm2, %v234_v9 }
 0x1b5   :  { %v239_v11 = vpop.f32.mrb[0].mxu1 }
 0x1b6   :  { %v191_v12 = vmul.f32 0.25, %v239_v11  ;;  %v181_v13 = vpop.f32.mrb[1].mxu1 }
 0x1b7   :  { %v190_v14 = vmul.f32 0.25, %v181_v13 }
 0x1b8   :  { %193 = vst.msk [vmem:[#allocation2 + $0x8] sm:$0xff] %vm21_vm0, %v191_v12 }
 0x1b9   :  { %192 = vst.msk [vmem:[#allocation2] sm:$0xff] %vm21_vm0, %v190_v14 }
 0x1ba   :  { %262 = shalt.err (!%p259_p4)
}
 0x1bb   :  { %s263_s28 = scalar_lea.hbm %s338_s3, 256 }
 0x1bc   :  { %p264_p5 = scmp.ne.s32.totalorder %s338_s3, %s263_s28  ;;  %p267_p6 = scmp.lt.u32.totalorder %s263_s28, %s338_s3 }
 0x1be   :  { %p269_p7 = pnand %p267_p6, %p264_p5 }
 0x1c0   :  { %272 = shalt.err (!%p269_p7)
}
 0x1c1   :  { %s276_s6 = smov 128   ;;  %s277_s7 = smov 8  }
 0x1c2   :  { %205 = dma.vmem_to_hbm [thread:$0]  %s200_s26, 256, %s338_s3, [#allocation3], %s276_s6, %s276_s6, %s277_s7  }
 0x1c3   :  { %273 = dma.done.wait [#allocation3], 256  }
 0x1c4   :  { %274 = vsyncadd [#allocation3], 4294967040 }
 0x1c5   :  { %209 = vsyncpa [#allocation3], 1 }

</bundles_post_ra>
